<compile_context>
chip_gen: v7x
topology: tpu7x:2x2x1
jax: 0.10.0
libtpu: 0.0.40
codegen_flags: <defaults>
</compile_context>

<pallas_src>
import functools

import jax
import jax.numpy as jnp
from jax.experimental import pallas as pl
from jax.experimental.pallas import tpu as pltpu

ENC_DIMS = [28 * 28, 128, 64, 12, 3]
DEC_DIMS = [3, 12, 64, 128, 28 * 28]
ALL_DIMS = ENC_DIMS + DEC_DIMS[1:]      # 784,128,64,12,3,12,64,128,784
N_LAYERS = len(ALL_DIMS) - 1            # 8 linear layers
LATENT_LAYER = 3                        # Linear(12,3): encoder output, no activation


def _linear_ae_kernel(x_ref, *rest):
    """Fused forward pass: 8 matmuls + ReLU / identity / Sigmoid, all in VMEM."""
    param_refs = rest[:-1]               # (w1, b1, ..., w8, b8)
    o_ref = rest[-1]

    h = x_ref[...].astype(jnp.float32)
    for layer in range(N_LAYERS):
        w = param_refs[2 * layer][...]                  # bf16 (in, out)
        b = param_refs[2 * layer + 1][...]              # f32  (1, out)
        # bf16 x bf16 on the MXU, f32 accumulation; bias add in f32 on the VPU.
        z = jnp.dot(h.astype(jnp.bfloat16), w,
                    preferred_element_type=jnp.float32) + b
        if layer == N_LAYERS - 1:
            h = jax.nn.sigmoid(z)        # numerically safe; exp goes to the EUP
        elif layer == LATENT_LAYER:
            h = z                        # latent layer: bare Linear, no activation
        else:
            h = jnp.maximum(z, 0.0)      # ReLU
    o_ref[...] = h.astype(o_ref.dtype)


def _round_up(x, m):
    return ((x + m - 1) // m) * m


def _choose_batch_tile(batch, batch_tile):
    """Pick the largest sensible batch tile.

    Prefers the requested fat tile; when the batch is too small for >=2 fat
    tiles, split it in half (rounded to the 8-sublane granule) so the grid
    still has >=2 steps and both v7x TensorCores get work.  Tiny batches just
    round up to one 8-row tile.
    """
    batch_tile = max(8, _round_up(batch_tile, 8))
    if batch >= 2 * batch_tile:
        return batch_tile
    half = _round_up(pl.cdiv(batch, 2), 8)
    return min(batch_tile, max(8, half))


@functools.partial(jax.jit, static_argnames=("batch_tile",))
def linear_ae_forward(x, params, batch_tile=256):
    """x: (B, 784) f32; params: list of (W_i, b_i), W_i (in,out) bf16, b_i (1,out) f32."""
    B, D_in = x.shape
    D_out = ALL_DIMS[-1]
    assert D_in == ALL_DIMS[0]

    tile_b = _choose_batch_tile(B, batch_tile)
    B_pad = _round_up(B, tile_b)
    if B_pad != B:
        x = jnp.pad(x, ((0, B_pad - B), (0, 0)))
    grid = (B_pad // tile_b,)

    flat_params = []
    for w, b in params:
        flat_params.append(w)
        flat_params.append(b)

    # x / out are tiled over the batch; weights & biases are grid-invariant
    # blocks (constant index_map -> no re-DMA across grid steps).
    in_specs = [pl.BlockSpec((tile_b, D_in), lambda i: (i, 0))]
    for w, b in params:
        in_specs.append(pl.BlockSpec(w.shape, lambda i: (0, 0)))
        in_specs.append(pl.BlockSpec(b.shape, lambda i: (0, 0)))
    out_spec = pl.BlockSpec((tile_b, D_out), lambda i: (i, 0))

    out = pl.pallas_call(
        _linear_ae_kernel,
        out_shape=jax.ShapeDtypeStruct((B_pad, D_out), x.dtype),
        grid=grid,
        in_specs=in_specs,
        out_specs=out_spec,
        compiler_params=pltpu.CompilerParams(
            dimension_semantics=("parallel",),
            # Real footprint at tile_b=256 is ~6-8 MiB (double-buffered x/out
            # tiles + bf16 weights + f32 activations); 32 MiB gives headroom
            # and stays well inside v7x's 64 MiB physical VMEM.
            vmem_limit_bytes=32 << 20,
        ),
    )(x, *flat_params)
    return out[:B] if B_pad != B else out


def init_params(key):
    """Deterministic PyTorch-style init: U(-1/sqrt(fan_in), 1/sqrt(fan_in)).

    Weights are stored (in, out) in bf16 (MXU-native, halves weight DMA/VMEM);
    biases stay (1, out) f32.
    """
    params = []
    for i in range(N_LAYERS):
        fan_in, fan_out = ALL_DIMS[i], ALL_DIMS[i + 1]
        key, kw, kb = jax.random.split(key, 3)
        bound = 1.0 / (fan_in ** 0.5)
        w = jax.random.uniform(kw, (fan_in, fan_out), jnp.float32, -bound, bound)
        b = jax.random.uniform(kb, (1, fan_out), jnp.float32, -bound, bound)
        params.append((w.astype(jnp.bfloat16), b))
    return params


def reference_forward(x, params):
    """Pure-JAX reference with matching numerics (bf16 operands, f32 accum)."""
    h = x.astype(jnp.float32)
    for i, (w, b) in enumerate(params):
        z = jnp.dot(h.astype(jnp.bfloat16), w.astype(jnp.bfloat16),
                    preferred_element_type=jnp.float32) + b.astype(jnp.float32)
        if i == N_LAYERS - 1:
            h = jax.nn.sigmoid(z)
        elif i == LATENT_LAYER:
            h = z
        else:
            h = jnp.maximum(z, 0.0)
    return h


if __name__ == "__main__":
    key = jax.random.PRNGKey(0)
    key, kx = jax.random.split(key)
    params = init_params(key)

    # Small demo batch (single tile path).
    B = 8
    x = jax.random.normal(kx, (B, 28 * 28), jnp.float32)
    out = jax.block_until_ready(linear_ae_forward(x, params))
    ref = reference_forward(x, params)
    assert out.shape == (B, 28 * 28), out.shape
    err = float(jnp.max(jnp.abs(out - ref)))
    assert err < 1e-4, err

    # Non-multiple batch to exercise padding + a 2-step "parallel" grid.
    B2 = 300
    x2 = jax.random.normal(jax.random.PRNGKey(1), (B2, 28 * 28), jnp.float32)
    out2 = jax.block_until_ready(linear_ae_forward(x2, params))
    ref2 = reference_forward(x2, params)
    assert out2.shape == (B2, 28 * 28), out2.shape
    err2 = float(jnp.max(jnp.abs(out2 - ref2)))
    assert err2 < 1e-4, err2

    print("KERNEL_OK")
</pallas_src>

<mosaic_0001>
module attributes {stable_mosaic.version = 11 : i64} {
  func.func @_linear_ae_kernel(%arg0: i32, %arg1: memref<8x784xf32, #tpu.memory_space<vmem>>, %arg2: memref<784x128xbf16, #tpu.memory_space<vmem>>, %arg3: memref<1x128xf32, #tpu.memory_space<vmem>>, %arg4: memref<128x64xbf16, #tpu.memory_space<vmem>>, %arg5: memref<1x64xf32, #tpu.memory_space<vmem>>, %arg6: memref<64x12xbf16, #tpu.memory_space<vmem>>, %arg7: memref<1x12xf32, #tpu.memory_space<vmem>>, %arg8: memref<12x3xbf16, #tpu.memory_space<vmem>>, %arg9: memref<1x3xf32, #tpu.memory_space<vmem>>, %arg10: memref<3x12xbf16, #tpu.memory_space<vmem>>, %arg11: memref<1x12xf32, #tpu.memory_space<vmem>>, %arg12: memref<12x64xbf16, #tpu.memory_space<vmem>>, %arg13: memref<1x64xf32, #tpu.memory_space<vmem>>, %arg14: memref<64x128xbf16, #tpu.memory_space<vmem>>, %arg15: memref<1x128xf32, #tpu.memory_space<vmem>>, %arg16: memref<128x784xbf16, #tpu.memory_space<vmem>>, %arg17: memref<1x784xf32, #tpu.memory_space<vmem>>, %arg18: memref<8x784xf32, #tpu.memory_space<vmem>>) attributes {dimension_semantics = [#tpu.dimension_semantics<parallel>], iteration_bounds = array<i64: 1>, scalar_prefetch = 0 : i64, scratch_operands = 0 : i64, tpu.core_type = #tpu.core_type<tc>, window_params = [{transform_indices = @transform_0, window_bounds = array<i64: 8, 784>}, {pipeline_mode = #tpu.pipeline_mode<synchronous>, transform_indices = @transform_1, window_bounds = array<i64: 784, 128>}, {pipeline_mode = #tpu.pipeline_mode<synchronous>, transform_indices = @transform_2, window_bounds = array<i64: 1, 128>}, {pipeline_mode = #tpu.pipeline_mode<synchronous>, transform_indices = @transform_3, window_bounds = array<i64: 128, 64>}, {pipeline_mode = #tpu.pipeline_mode<synchronous>, transform_indices = @transform_4, window_bounds = array<i64: 1, 64>}, {pipeline_mode = #tpu.pipeline_mode<synchronous>, transform_indices = @transform_5, window_bounds = array<i64: 64, 12>}, {pipeline_mode = #tpu.pipeline_mode<synchronous>, transform_indices = @transform_6, window_bounds = array<i64: 1, 12>}, {pipeline_mode = #tpu.pipeline_mode<synchronous>, transform_indices = @transform_7, window_bounds = array<i64: 12, 3>}, {pipeline_mode = #tpu.pipeline_mode<synchronous>, transform_indices = @transform_8, window_bounds = array<i64: 1, 3>}, {pipeline_mode = #tpu.pipeline_mode<synchronous>, transform_indices = @transform_9, window_bounds = array<i64: 3, 12>}, {pipeline_mode = #tpu.pipeline_mode<synchronous>, transform_indices = @transform_10, window_bounds = array<i64: 1, 12>}, {pipeline_mode = #tpu.pipeline_mode<synchronous>, transform_indices = @transform_11, window_bounds = array<i64: 12, 64>}, {pipeline_mode = #tpu.pipeline_mode<synchronous>, transform_indices = @transform_12, window_bounds = array<i64: 1, 64>}, {pipeline_mode = #tpu.pipeline_mode<synchronous>, transform_indices = @transform_13, window_bounds = array<i64: 64, 128>}, {pipeline_mode = #tpu.pipeline_mode<synchronous>, transform_indices = @transform_14, window_bounds = array<i64: 1, 128>}, {pipeline_mode = #tpu.pipeline_mode<synchronous>, transform_indices = @transform_15, window_bounds = array<i64: 128, 784>}, {pipeline_mode = #tpu.pipeline_mode<synchronous>, transform_indices = @transform_16, window_bounds = array<i64: 1, 784>}, {transform_indices = @transform_17, window_bounds = array<i64: 8, 784>}]} {
    %c0 = arith.constant 0 : index
    %c0_0 = arith.constant 0 : index
    %0 = vector.load %arg1[%c0, %c0_0] : memref<8x784xf32, #tpu.memory_space<vmem>>, vector<8x784xf32>
    %c0_1 = arith.constant 0 : index
    %c0_2 = arith.constant 0 : index
    %1 = vector.load %arg2[%c0_1, %c0_2] : memref<784x128xbf16, #tpu.memory_space<vmem>>, vector<784x128xbf16>
    %c0_3 = arith.constant 0 : index
    %c0_4 = arith.constant 0 : index
    %2 = vector.load %arg3[%c0_3, %c0_4] : memref<1x128xf32, #tpu.memory_space<vmem>>, vector<1x128xf32>
    %3 = arith.truncf %0 : vector<8x784xf32> to vector<8x784xbf16>
    %cst = arith.constant dense<0.000000e+00> : vector<8x128xf32>
    %4 = tpu.matmul %3, %1, %cst {dimension_numbers = #tpu.dot_dimension_numbers<[1], [0], [0], [1], [0, 0, 1, 1], [], []>} : vector<8x784xbf16>, vector<784x128xbf16>, vector<8x128xf32> -> vector<8x128xf32>
    %5 = vector.broadcast %2 : vector<1x128xf32> to vector<8x128xf32>
    %6 = arith.addf %4, %5 : vector<8x128xf32>
    %cst_5 = arith.constant 0.000000e+00 : f32
    %7 = vector.broadcast %cst_5 : f32 to vector<8x128xf32>
    %8 = arith.maximumf %6, %7 : vector<8x128xf32>
    %c0_6 = arith.constant 0 : index
    %c0_7 = arith.constant 0 : index
    %9 = vector.load %arg4[%c0_6, %c0_7] : memref<128x64xbf16, #tpu.memory_space<vmem>>, vector<128x64xbf16>
    %c0_8 = arith.constant 0 : index
    %c0_9 = arith.constant 0 : index
    %10 = vector.load %arg5[%c0_8, %c0_9] : memref<1x64xf32, #tpu.memory_space<vmem>>, vector<1x64xf32>
    %11 = arith.truncf %8 : vector<8x128xf32> to vector<8x128xbf16>
    %cst_10 = arith.constant dense<0.000000e+00> : vector<8x64xf32>
    %12 = tpu.matmul %11, %9, %cst_10 {dimension_numbers = #tpu.dot_dimension_numbers<[1], [0], [0], [1], [0, 0, 1, 1], [], []>} : vector<8x128xbf16>, vector<128x64xbf16>, vector<8x64xf32> -> vector<8x64xf32>
    %13 = vector.broadcast %10 : vector<1x64xf32> to vector<8x64xf32>
    %14 = arith.addf %12, %13 : vector<8x64xf32>
    %cst_11 = arith.constant 0.000000e+00 : f32
    %15 = vector.broadcast %cst_11 : f32 to vector<8x64xf32>
    %16 = arith.maximumf %14, %15 : vector<8x64xf32>
    %c0_12 = arith.constant 0 : index
    %c0_13 = arith.constant 0 : index
    %17 = vector.load %arg6[%c0_12, %c0_13] : memref<64x12xbf16, #tpu.memory_space<vmem>>, vector<64x12xbf16>
    %c0_14 = arith.constant 0 : index
    %c0_15 = arith.constant 0 : index
    %18 = vector.load %arg7[%c0_14, %c0_15] : memref<1x12xf32, #tpu.memory_space<vmem>>, vector<1x12xf32>
    %19 = arith.truncf %16 : vector<8x64xf32> to vector<8x64xbf16>
    %cst_16 = arith.constant dense<0.000000e+00> : vector<8x12xf32>
    %20 = tpu.matmul %19, %17, %cst_16 {dimension_numbers = #tpu.dot_dimension_numbers<[1], [0], [0], [1], [0, 0, 1, 1], [], []>} : vector<8x64xbf16>, vector<64x12xbf16>, vector<8x12xf32> -> vector<8x12xf32>
    %21 = vector.broadcast %18 : vector<1x12xf32> to vector<8x12xf32>
    %22 = arith.addf %20, %21 : vector<8x12xf32>
    %cst_17 = arith.constant 0.000000e+00 : f32
    %23 = vector.broadcast %cst_17 : f32 to vector<8x12xf32>
    %24 = arith.maximumf %22, %23 : vector<8x12xf32>
    %c0_18 = arith.constant 0 : index
    %c0_19 = arith.constant 0 : index
    %25 = vector.load %arg8[%c0_18, %c0_19] : memref<12x3xbf16, #tpu.memory_space<vmem>>, vector<12x3xbf16>
    %c0_20 = arith.constant 0 : index
    %c0_21 = arith.constant 0 : index
    %26 = vector.load %arg9[%c0_20, %c0_21] : memref<1x3xf32, #tpu.memory_space<vmem>>, vector<1x3xf32>
    %27 = arith.truncf %24 : vector<8x12xf32> to vector<8x12xbf16>
    %cst_22 = arith.constant dense<0.000000e+00> : vector<8x3xf32>
    %28 = tpu.matmul %27, %25, %cst_22 {dimension_numbers = #tpu.dot_dimension_numbers<[1], [0], [0], [1], [0, 0, 1, 1], [], []>} : vector<8x12xbf16>, vector<12x3xbf16>, vector<8x3xf32> -> vector<8x3xf32>
    %29 = vector.broadcast %26 : vector<1x3xf32> to vector<8x3xf32>
    %30 = arith.addf %28, %29 : vector<8x3xf32>
    %c0_23 = arith.constant 0 : index
    %c0_24 = arith.constant 0 : index
    %31 = vector.load %arg10[%c0_23, %c0_24] : memref<3x12xbf16, #tpu.memory_space<vmem>>, vector<3x12xbf16>
    %c0_25 = arith.constant 0 : index
    %c0_26 = arith.constant 0 : index
    %32 = vector.load %arg11[%c0_25, %c0_26] : memref<1x12xf32, #tpu.memory_space<vmem>>, vector<1x12xf32>
    %33 = arith.truncf %30 : vector<8x3xf32> to vector<8x3xbf16>
    %cst_27 = arith.constant dense<0.000000e+00> : vector<8x12xf32>
    %34 = tpu.matmul %33, %31, %cst_27 {dimension_numbers = #tpu.dot_dimension_numbers<[1], [0], [0], [1], [0, 0, 1, 1], [], []>} : vector<8x3xbf16>, vector<3x12xbf16>, vector<8x12xf32> -> vector<8x12xf32>
    %35 = vector.broadcast %32 : vector<1x12xf32> to vector<8x12xf32>
    %36 = arith.addf %34, %35 : vector<8x12xf32>
    %cst_28 = arith.constant 0.000000e+00 : f32
    %37 = vector.broadcast %cst_28 : f32 to vector<8x12xf32>
    %38 = arith.maximumf %36, %37 : vector<8x12xf32>
    %c0_29 = arith.constant 0 : index
    %c0_30 = arith.constant 0 : index
    %39 = vector.load %arg12[%c0_29, %c0_30] : memref<12x64xbf16, #tpu.memory_space<vmem>>, vector<12x64xbf16>
    %c0_31 = arith.constant 0 : index
    %c0_32 = arith.constant 0 : index
    %40 = vector.load %arg13[%c0_31, %c0_32] : memref<1x64xf32, #tpu.memory_space<vmem>>, vector<1x64xf32>
    %41 = arith.truncf %38 : vector<8x12xf32> to vector<8x12xbf16>
    %cst_33 = arith.constant dense<0.000000e+00> : vector<8x64xf32>
    %42 = tpu.matmul %41, %39, %cst_33 {dimension_numbers = #tpu.dot_dimension_numbers<[1], [0], [0], [1], [0, 0, 1, 1], [], []>} : vector<8x12xbf16>, vector<12x64xbf16>, vector<8x64xf32> -> vector<8x64xf32>
    %43 = vector.broadcast %40 : vector<1x64xf32> to vector<8x64xf32>
    %44 = arith.addf %42, %43 : vector<8x64xf32>
    %cst_34 = arith.constant 0.000000e+00 : f32
    %45 = vector.broadcast %cst_34 : f32 to vector<8x64xf32>
    %46 = arith.maximumf %44, %45 : vector<8x64xf32>
    %c0_35 = arith.constant 0 : index
    %c0_36 = arith.constant 0 : index
    %47 = vector.load %arg14[%c0_35, %c0_36] : memref<64x128xbf16, #tpu.memory_space<vmem>>, vector<64x128xbf16>
    %c0_37 = arith.constant 0 : index
    %c0_38 = arith.constant 0 : index
    %48 = vector.load %arg15[%c0_37, %c0_38] : memref<1x128xf32, #tpu.memory_space<vmem>>, vector<1x128xf32>
    %49 = arith.truncf %46 : vector<8x64xf32> to vector<8x64xbf16>
    %cst_39 = arith.constant dense<0.000000e+00> : vector<8x128xf32>
    %50 = tpu.matmul %49, %47, %cst_39 {dimension_numbers = #tpu.dot_dimension_numbers<[1], [0], [0], [1], [0, 0, 1, 1], [], []>} : vector<8x64xbf16>, vector<64x128xbf16>, vector<8x128xf32> -> vector<8x128xf32>
    %51 = vector.broadcast %48 : vector<1x128xf32> to vector<8x128xf32>
    %52 = arith.addf %50, %51 : vector<8x128xf32>
    %cst_40 = arith.constant 0.000000e+00 : f32
    %53 = vector.broadcast %cst_40 : f32 to vector<8x128xf32>
    %54 = arith.maximumf %52, %53 : vector<8x128xf32>
    %c0_41 = arith.constant 0 : index
    %c0_42 = arith.constant 0 : index
    %55 = vector.load %arg16[%c0_41, %c0_42] : memref<128x784xbf16, #tpu.memory_space<vmem>>, vector<128x784xbf16>
    %c0_43 = arith.constant 0 : index
    %c0_44 = arith.constant 0 : index
    %56 = vector.load %arg17[%c0_43, %c0_44] : memref<1x784xf32, #tpu.memory_space<vmem>>, vector<1x784xf32>
    %57 = arith.truncf %54 : vector<8x128xf32> to vector<8x128xbf16>
    %cst_45 = arith.constant dense<0.000000e+00> : vector<8x784xf32>
    %58 = tpu.matmul %57, %55, %cst_45 {dimension_numbers = #tpu.dot_dimension_numbers<[1], [0], [0], [1], [0, 0, 1, 1], [], []>} : vector<8x128xbf16>, vector<128x784xbf16>, vector<8x784xf32> -> vector<8x784xf32>
    %59 = vector.broadcast %56 : vector<1x784xf32> to vector<8x784xf32>
    %60 = arith.addf %58, %59 : vector<8x784xf32>
    %61 = arith.negf %60 : vector<8x784xf32>
    %62 = math.exp %61 : vector<8x784xf32>
    %cst_46 = arith.constant 1.000000e+00 : f32
    %63 = vector.broadcast %cst_46 : f32 to vector<8x784xf32>
    %64 = arith.addf %63, %62 : vector<8x784xf32>
    %65 = arith.divf %63, %64 : vector<8x784xf32>
    %c0_47 = arith.constant 0 : index
    %c0_48 = arith.constant 0 : index
    %66 = vector.load %arg18[%c0_47, %c0_48] : memref<8x784xf32, #tpu.memory_space<vmem>>, vector<8x784xf32>
    tpu.vector_store %arg18[%c0_47, %c0_48], %65 {strides = array<i32>} : memref<8x784xf32, #tpu.memory_space<vmem>>, vector<8x784xf32>,
    return
  }
  func.func @transform_0(%arg0: i32) -> (i32, i32) {
    %c0_i32 = arith.constant 0 : i32
    %c0_i32_0 = arith.constant 0 : i32
    return %arg0, %c0_i32 : i32, i32
  }
  func.func @transform_1(%arg0: i32) -> (i32, i32) {
    %c0_i32 = arith.constant 0 : i32
    %c0_i32_0 = arith.constant 0 : i32
    %c0_i32_1 = arith.constant 0 : i32
    return %c0_i32, %c0_i32_0 : i32, i32
  }
  func.func @transform_2(%arg0: i32) -> (i32, i32) {
    %c0_i32 = arith.constant 0 : i32
    %c0_i32_0 = arith.constant 0 : i32
    %c0_i32_1 = arith.constant 0 : i32
    return %c0_i32, %c0_i32_0 : i32, i32
  }
  func.func @transform_3(%arg0: i32) -> (i32, i32) {
    %c0_i32 = arith.constant 0 : i32
    %c0_i32_0 = arith.constant 0 : i32
    %c0_i32_1 = arith.constant 0 : i32
    return %c0_i32, %c0_i32_0 : i32, i32
  }
  func.func @transform_4(%arg0: i32) -> (i32, i32) {
    %c0_i32 = arith.constant 0 : i32
    %c0_i32_0 = arith.constant 0 : i32
    %c0_i32_1 = arith.constant 0 : i32
    return %c0_i32, %c0_i32_0 : i32, i32
  }
  func.func @transform_5(%arg0: i32) -> (i32, i32) {
    %c0_i32 = arith.constant 0 : i32
    %c0_i32_0 = arith.constant 0 : i32
    %c0_i32_1 = arith.constant 0 : i32
    return %c0_i32, %c0_i32_0 : i32, i32
  }
  func.func @transform_6(%arg0: i32) -> (i32, i32) {
    %c0_i32 = arith.constant 0 : i32
    %c0_i32_0 = arith.constant 0 : i32
    %c0_i32_1 = arith.constant 0 : i32
    return %c0_i32, %c0_i32_0 : i32, i32
  }
  func.func @transform_7(%arg0: i32) -> (i32, i32) {
    %c0_i32 = arith.constant 0 : i32
    %c0_i32_0 = arith.constant 0 : i32
    %c0_i32_1 = arith.constant 0 : i32
    return %c0_i32, %c0_i32_0 : i32, i32
  }
  func.func @transform_8(%arg0: i32) -> (i32, i32) {
    %c0_i32 = arith.constant 0 : i32
    %c0_i32_0 = arith.constant 0 : i32
    %c0_i32_1 = arith.constant 0 : i32
    return %c0_i32, %c0_i32_0 : i32, i32
  }
  func.func @transform_9(%arg0: i32) -> (i32, i32) {
    %c0_i32 = arith.constant 0 : i32
    %c0_i32_0 = arith.constant 0 : i32
    %c0_i32_1 = arith.constant 0 : i32
    return %c0_i32, %c0_i32_0 : i32, i32
  }
  func.func @transform_10(%arg0: i32) -> (i32, i32) {
    %c0_i32 = arith.constant 0 : i32
    %c0_i32_0 = arith.constant 0 : i32
    %c0_i32_1 = arith.constant 0 : i32
    return %c0_i32, %c0_i32_0 : i32, i32
  }
  func.func @transform_11(%arg0: i32) -> (i32, i32) {
    %c0_i32 = arith.constant 0 : i32
    %c0_i32_0 = arith.constant 0 : i32
    %c0_i32_1 = arith.constant 0 : i32
    return %c0_i32, %c0_i32_0 : i32, i32
  }
  func.func @transform_12(%arg0: i32) -> (i32, i32) {
    %c0_i32 = arith.constant 0 : i32
    %c0_i32_0 = arith.constant 0 : i32
    %c0_i32_1 = arith.constant 0 : i32
    return %c0_i32, %c0_i32_0 : i32, i32
  }
  func.func @transform_13(%arg0: i32) -> (i32, i32) {
    %c0_i32 = arith.constant 0 : i32
    %c0_i32_0 = arith.constant 0 : i32
    %c0_i32_1 = arith.constant 0 : i32
    return %c0_i32, %c0_i32_0 : i32, i32
  }
  func.func @transform_14(%arg0: i32) -> (i32, i32) {
    %c0_i32 = arith.constant 0 : i32
    %c0_i32_0 = arith.constant 0 : i32
    %c0_i32_1 = arith.constant 0 : i32
    return %c0_i32, %c0_i32_0 : i32, i32
  }
  func.func @transform_15(%arg0: i32) -> (i32, i32) {
    %c0_i32 = arith.constant 0 : i32
    %c0_i32_0 = arith.constant 0 : i32
    %c0_i32_1 = arith.constant 0 : i32
    return %c0_i32, %c0_i32_0 : i32, i32
  }
  func.func @transform_16(%arg0: i32) -> (i32, i32) {
    %c0_i32 = arith.constant 0 : i32
    %c0_i32_0 = arith.constant 0 : i32
    %c0_i32_1 = arith.constant 0 : i32
    return %c0_i32, %c0_i32_0 : i32, i32
  }
  func.func @transform_17(%arg0: i32) -> (i32, i32) {
    %c0_i32 = arith.constant 0 : i32
    %c0_i32_0 = arith.constant 0 : i32
    return %arg0, %c0_i32 : i32, i32
  }
}

</mosaic_0001>

<bundles_post_ra>
// kernel: linear_ae_forward.1
= control target key start
LH: loop header
LB: loop body
LE: loop exit
PB: predicated region body
PF: predicated region fallthrough
CT: control target
= control target key end

     0   :  { %s2833_s0 = inlined_call_operand.vmem [shape: f32[8,784], index: 0, kind: input, shape index: {}]   ;;  %s2834_s1 = inlined_call_operand.vmem [shape: bf16[784,128], index: 1, kind: input, shape index: {}]   ;;  %s2835_s2 = inlined_call_operand.vmem [shape: f32[1,128], index: 2, kind: input, shape index: {}]   ;;  %s2836_s3 = inlined_call_operand.vmem [shape: bf16[128,64], index: 3, kind: input, shape index: {}]   ;;  %s2837_s4 = inlined_call_operand.vmem [shape: f32[1,64], index: 4, kind: input, shape index: {}]   ;;  %s2838_s5 = inlined_call_operand.vmem [shape: bf16[64,12], index: 5, kind: input, shape index: {}]   ;;  %s2839_s6 = inlined_call_operand.vmem [shape: f32[1,12], index: 6, kind: input, shape index: {}]   ;;  %s2840_s7 = inlined_call_operand.vmem [shape: bf16[12,3], index: 7, kind: input, shape index: {}]   ;;  %s2841_s8 = inlined_call_operand.vmem [shape: f32[1,3], index: 8, kind: input, shape index: {}]   ;;  %s2842_s9 = inlined_call_operand.vmem [shape: bf16[3,12], index: 9, kind: input, shape index: {}]   ;;  %s2843_s10 = inlined_call_operand.vmem [shape: f32[1,12], index: 10, kind: input, shape index: {}]   ;;  %s2844_s11 = inlined_call_operand.vmem [shape: bf16[12,64], index: 11, kind: input, shape index: {}]   ;;  %s2845_s12 = inlined_call_operand.vmem [shape: f32[1,64], index: 12, kind: input, shape index: {}]   ;;  %s2846_s13 = inlined_call_operand.vmem [shape: bf16[64,128], index: 13, kind: input, shape index: {}]   ;;  %s2847_s14 = inlined_call_operand.vmem [shape: f32[1,128], index: 14, kind: input, shape index: {}]   ;;  %s2848_s15 = inlined_call_operand.vmem [shape: bf16[128,784], index: 15, kind: input, shape index: {}]   ;;  %s2849_s16 = inlined_call_operand.vmem [shape: f32[1,784], index: 16, kind: input, shape index: {}]   ;;  %s2850_s17 = inlined_call_operand.hbm [shape: f32[8,784], index: 17, kind: output, shape index: {}]  }
   0x1   :  { %2853 = sst [smem:[#allocation5_spill]] %s2833_s0 }
   0x2   :  { %2854 = sst [smem:[#allocation6_spill]] %s2834_s1 }
   0x3   :  { %s2855_s26 = sld [smem:[#allocation6_spill]]  ;;  %s2856_s19 = sld [smem:[#allocation5_spill]]  ;;  %v2257_v44 = vmov 0.0   ;;  %vm2258_vm0 = vmmov 0   ;;  %vm471_vm1 = vcmask 130048  }
   0x9   :  { %v2058_v0 = vld [vmem:[%s2855_s26 + $0x40] sm:$0xff]   ;;  %v2062_v4 = vld [vmem:[%s2855_s26 + $0x48] sm:$0xff]   ;;  %v2066_v8 = vld [vmem:[%s2855_s26 + $0x50] sm:$0xff]  }
   0xa   :  { %v2059_v1 = vld [vmem:[%s2855_s26] sm:$0xff]   ;;  %1863 = vmatprep.subr.bf16.mxu0 %v2058_v0  ;;  %v2063_v5 = vld [vmem:[%s2855_s26 + $0x8] sm:$0xff]   ;;  %v2067_v9 = vld [vmem:[%s2855_s26 + $0x10] sm:$0xff]  }
   0xb   :  { %v2060_v2 = vld [vmem:[%s2855_s26 + $0xc0] sm:$0xff]   ;;  %1864 = vmatpush3.bf16.msra.mxu0 %v2059_v1  ;;  %v2064_v6 = vld [vmem:[%s2855_s26 + $0xc8] sm:$0xff]   ;;  %v2068_v10 = vld [vmem:[%s2855_s26 + $0xd0] sm:$0xff]  }
   0xc   :  { %v2061_v3 = vld [vmem:[%s2855_s26 + $0x80] sm:$0xff]   ;;  %1885 = vmatprep.subr.bf16.mxu1 %v2060_v2  ;;  %1865 = vmatprep.subr.bf16.mxu0 %v2062_v4  ;;  %v2065_v7 = vld [vmem:[%s2855_s26 + $0x88] sm:$0xff]   ;;  %v2069_v11 = vld [vmem:[%s2855_s26 + $0x90] sm:$0xff]  }
   0xd   :  { %1886 = vmatpush3.bf16.msra.mxu1 %v2061_v3  ;;  %v2070_v12 = vld [vmem:[%s2855_s26 + $0x58] sm:$0xff]   ;;  %v2074_v16 = vld [vmem:[%s2855_s26 + $0x60] sm:$0xff]   ;;  %v2078_v20 = vld [vmem:[%s2855_s26 + $0x68] sm:$0xff]  }
   0xe   :  { %1887 = vmatprep.subr.bf16.mxu1 %v2064_v6  ;;  %v2071_v13 = vld [vmem:[%s2855_s26 + $0x18] sm:$0xff]   ;;  %v2075_v17 = vld [vmem:[%s2855_s26 + $0x20] sm:$0xff]   ;;  %v2079_v21 = vld [vmem:[%s2855_s26 + $0x28] sm:$0xff]  }
   0xf   :  { %1866 = vmatpush3.bf16.msra.mxu0 %v2063_v5  ;;  %v2072_v14 = vld [vmem:[%s2855_s26 + $0xd8] sm:$0xff]   ;;  %v2076_v18 = vld [vmem:[%s2855_s26 + $0xe0] sm:$0xff]   ;;  %v2080_v22 = vld [vmem:[%s2855_s26 + $0xe8] sm:$0xff]  }
  0x10   :  { %1867 = vmatprep.subr.bf16.mxu0 %v2066_v8  ;;  %v2073_v15 = vld [vmem:[%s2855_s26 + $0x98] sm:$0xff]   ;;  %v2077_v19 = vld [vmem:[%s2855_s26 + $0xa0] sm:$0xff]   ;;  %v2081_v23 = vld [vmem:[%s2855_s26 + $0xa8] sm:$0xff]  }
  0x11   :  { %1888 = vmatpush3.bf16.msra.mxu1 %v2065_v7  ;;  %v2082_v24 = vld [vmem:[%s2855_s26 + $0x70] sm:$0xff]   ;;  %v2086_v28 = vld [vmem:[%s2855_s26 + $0x78] sm:$0xff]   ;;  %v59_v31 = vld [vmem:[%s2856_s19 + $0x8] sm:$0xff] }
  0x12   :  { %1889 = vmatprep.subr.bf16.mxu1 %v2068_v10  ;;  %v2083_v25 = vld [vmem:[%s2855_s26 + $0x30] sm:$0xff]   ;;  %v2087_v29 = vld [vmem:[%s2855_s26 + $0x38] sm:$0xff]   ;;  %v165_v32 = vpack.c.bf16 %v59_v31, %v59_v31  ;;  %v58_v34 = vld [vmem:[%s2856_s19] sm:$0xff] }
  0x13   :  { %1868 = vmatpush3.bf16.msra.mxu0 %v2067_v9  ;;  %v2084_v26 = vld [vmem:[%s2855_s26 + $0xf0] sm:$0xff]   ;;  %v2088_v30 = vld [vmem:[%s2855_s26 + $0xf8] sm:$0xff]   ;;  %v164_v35 = vpack.c.bf16 %v58_v34, %v58_v34  ;;  %v2090_v36 = vld [vmem:[%s2855_s26 + $0x140] sm:$0xff]  }
  0x14   :  { %1869 = vmatprep.subr.bf16.mxu0 %v2070_v12  ;;  %v2085_v27 = vld [vmem:[%s2855_s26 + $0xb0] sm:$0xff]   ;;  %v2089_v33 = vld [vmem:[%s2855_s26 + $0xb8] sm:$0xff]   ;;  %507 = vmatprep.mubr.bf16.mxu0 %v165_v32  ;;  %v2091_v39 = vld [vmem:[%s2855_s26 + $0x100] sm:$0xff]  }
  0x15   :  { %1890 = vmatpush3.bf16.msra.mxu1 %v2069_v11  ;;  %v61_v37 = vld [vmem:[%s2856_s19 + $0x18] sm:$0xff]  ;;  %v60_v40 = vld [vmem:[%s2856_s19 + $0x10] sm:$0xff]  ;;  %v2092_v42 = vld [vmem:[%s2855_s26 + $0x148] sm:$0xff]  }
  0x16   :  { %1891 = vmatprep.subr.bf16.mxu1 %v2072_v14  ;;  %v167_v38 = vpack.c.bf16 %v61_v37, %v61_v37  ;;  %v166_v41 = vpack.c.bf16 %v60_v40, %v60_v40  ;;  %v2093_v43 = vld [vmem:[%s2855_s26 + $0x108] sm:$0xff]   ;;  %v2094_v45 = vld [vmem:[%s2855_s26 + $0x150] sm:$0xff]   ;;  %v2096_v47 = vld [vmem:[%s2855_s26 + $0x158] sm:$0xff]  }
  0x17   :  { %1870 = vmatpush3.bf16.msra.mxu0 %v2071_v13  ;;  %v2095_v46 = vld [vmem:[%s2855_s26 + $0x110] sm:$0xff]   ;;  %v2097_v48 = vld [vmem:[%s2855_s26 + $0x118] sm:$0xff]   ;;  %v2098_v49 = vld [vmem:[%s2855_s26 + $0x160] sm:$0xff]  }
  0x18   :  { %1871 = vmatprep.subr.bf16.mxu0 %v2074_v16  ;;  %547 = vmatprep.mubr.bf16.mxu1 %v167_v38  ;;  %v2099_v50 = vld [vmem:[%s2855_s26 + $0x120] sm:$0xff]   ;;  %v2100_v51 = vld [vmem:[%s2855_s26 + $0x168] sm:$0xff]   ;;  %v2102_v55 = vld [vmem:[%s2855_s26 + $0x170] sm:$0xff]  }
  0x19   :  { %1892 = vmatpush3.bf16.msra.mxu1 %v2073_v15  ;;  %v2101_v52 = vld [vmem:[%s2855_s26 + $0x128] sm:$0xff]   ;;  %v2106_v53 = vld [vmem:[%s2855_s26 + $0x180] sm:$0xff]   ;;  %v64_v57 = vld [vmem:[%s2856_s19 + $0x30] sm:$0xff] }
  0x1a   :  { %1893 = vmatprep.subr.bf16.mxu1 %v2076_v18  ;;  %v63_v54 = vld [vmem:[%s2856_s19 + $0x28] sm:$0xff]  ;;  %v170_v58 = vpack.c.bf16 %v64_v57, %v64_v57  ;;  %v2103_v59 = vld [vmem:[%s2855_s26 + $0x130] sm:$0xff]   ;;  %v2104_v60 = vld [vmem:[%s2855_s26 + $0x178] sm:$0xff]  }
  0x1b   :  { %1872 = vmatpush3.bf16.msra.mxu0 %v2075_v17  ;;  %v169_v56 = vpack.c.bf16 %v63_v54, %v63_v54  ;;  %v2105_v61 = vld [vmem:[%s2855_s26 + $0x138] sm:$0xff]   ;;  %v62_v62 = vld [vmem:[%s2856_s19 + $0x20] sm:$0xff] }
  0x1c   :  { %1873 = vmatprep.subr.bf16.mxu0 %v2078_v20  ;;  %v168_v63 = vpack.c.bf16 %v62_v62, %v62_v62 }
  0x1d   :  { %1894 = vmatpush3.bf16.msra.mxu1 %v2077_v19 }
  0x1e   :  { %1895 = vmatprep.subr.bf16.mxu1 %v2080_v22 }
  0x1f   :  { %1874 = vmatpush3.bf16.msra.mxu0 %v2079_v21 }
  0x20   :  { %1875 = vmatprep.subr.bf16.mxu0 %v2082_v24 }
  0x21   :  { %1896 = vmatpush3.bf16.msra.mxu1 %v2081_v23 }
  0x22   :  { %1897 = vmatprep.subr.bf16.mxu1 %v2084_v26 }
  0x23   :  { %1876 = vmatpush3.bf16.msra.mxu0 %v2083_v25 }
  0x24   :  { %1877 = vmatprep.subr.bf16.mxu0 %v2086_v28 }
  0x25   :  { %1898 = vmatpush3.bf16.msra.mxu1 %v2085_v27 }
  0x26   :  { %1899 = vmatprep.subr.bf16.mxu1 %v2088_v30 }
  0x27   :  { %1878 = vmatpush3.bf16.msra.mxu0 %v2087_v29 }
  0x28   :  { %1907 = vmatprep.subr.bf16.mxu0 %v2090_v36 }
  0x29   :  { %1900 = vmatpush3.bf16.msra.mxu1 %v2089_v33 }
  0x2a   :  { %508 = vmatmul.mubr.bf16.vlgmr.msra.gmra.mrb[0].mxu0 %v164_v35  ;;  %1965 = vmatprep.subr.bf16.mxu1 %v2257_v44 }
  0x2b   :  { %1908 = vmatpush3.bf16.msra.mxu0 %v2091_v39  ;;  %587 = vmatprep.mubr.bf16.mxu0 %v169_v56 }
  0x2c   :  { %548 = vmatmul.mubr.bf16.vlgmr.msra.gmra.mrb[0].mxu1 %v166_v41  ;;  %1909 = vmatprep.subr.bf16.mxu0 %v2092_v42 }
  0x2d   :  { %1967 = vmatprep.mubr.msk.bf16.mxu1 %vm2258_vm0, %v2257_v44  ;;  %1966 = vmatpush3.bf16.msra.mxu1 %v2106_v53 }
  0x2e   :  { %1971 = vmatprep.subr.bf16.mxu1 %v2257_v44 }
  0x2f   :  { %1910 = vmatpush3.bf16.msra.mxu0 %v2093_v43 }
  0x30   :  { %1911 = vmatprep.subr.bf16.mxu0 %v2094_v45 }
  0x33   :  { %1912 = vmatpush3.bf16.msra.mxu0 %v2095_v46 }
  0x34   :  { %1913 = vmatprep.subr.bf16.mxu0 %v2096_v47  ;;  %1968 = vmatmul.mubr.msk.bf16.vlgmr.msra.gmra.mrb[4].mxu1 %vm471_vm1, %v170_v58 }
  0x35   :  { %1987 = vmatprep.mubr.msk.bf16.mxu1 %vm2258_vm0, %v2257_v44 }
  0x37   :  { %1914 = vmatpush3.bf16.msra.mxu0 %v2097_v48 }
  0x38   :  { %1915 = vmatprep.subr.bf16.mxu0 %v2098_v49 }
  0x3b   :  { %1916 = vmatpush3.bf16.msra.mxu0 %v2099_v50 }
  0x3c   :  { %1917 = vmatprep.subr.bf16.mxu0 %v2100_v51 }
  0x3f   :  { %1918 = vmatpush3.bf16.msra.mxu0 %v2101_v52 }
  0x40   :  { %1919 = vmatprep.subr.bf16.mxu0 %v2102_v55 }
  0x43   :  { %1920 = vmatpush3.bf16.msra.mxu0 %v2103_v59 }
  0x44   :  { %1921 = vmatprep.subr.bf16.mxu0 %v2104_v60 }
  0x47   :  { %1922 = vmatpush3.bf16.msra.mxu0 %v2105_v61 }
  0x48   :  { %1991 = vmatprep.subr.bf16.mxu0 %v2257_v44 }
  0x4a   :  { %588 = vmatmul.mubr.bf16.vlgmr.msra.gmra.mrb[4].mxu0 %v168_v63 }
  0x4b   :  { %1999 = vmatprep.mubr.msk.bf16.mxu0 %vm2258_vm0, %v2257_v44 }
  0x4c   :  { %22 = vsyncpa [#allocation3], 0  ;;  %v2107_v0 = vld [vmem:[%s2836_s3] sm:$0xff]   ;;  %v2108_v1 = vld [vmem:[%s2836_s3 + $0x8] sm:$0xff]   ;;  %vm853_vm2 = vcmask 1045504   ;;  %vm789_vm3 = vcmask 523264  }
  0x4d   :  { %1972 = vmatpush3.bf16.msra.mxu1 %v2107_v0  ;;  %v2109_v2 = vld [vmem:[%s2836_s3 + $0x10] sm:$0xff]   ;;  %v2110_v3 = vld [vmem:[%s2836_s3 + $0x18] sm:$0xff]   ;;  %v2111_v4 = vld [vmem:[%s2836_s3 + $0x20] sm:$0xff]   ;;  %vm910_vm4 = vcmask 1040384   ;;  %vm911_vm5 = vcmask 1041408   ;;  %v2259_v50 = vmov 65535  }
  0x4e   :  { %1973 = vmatprep.subr.bf16.mxu1 %v2257_v44  ;;  %v2112_v5 = vld [vmem:[%s2836_s3 + $0x28] sm:$0xff]   ;;  %v2113_v6 = vld [vmem:[%s2836_s3 + $0x30] sm:$0xff]   ;;  %v2114_v7 = vld [vmem:[%s2836_s3 + $0x38] sm:$0xff]   ;;  %v912_v51 = vsel %vm910_vm4, 4294967295, %v2259_v50  ;;  %vm849_vm6 = vcmask 97280   ;;  %vm906_vm7 = vcmask 23552  }
  0x4f   :  { %v2115_v8 = vld [vmem:[%s2838_s5] sm:$0xff]   ;;  %v2116_v9 = vld [vmem:[%s2838_s5 + $0x8] sm:$0xff]   ;;  %v2117_v36 = vld [vmem:[%s2838_s5 + $0x10] sm:$0xff]   ;;  %v913_v56 = vsel %vm911_vm5, %v912_v51, 0 }
  0x50   :  { %1992 = vmatpush3.bf16.msra.mxu0 %v2115_v8  ;;  %v1720_v11 = vld [vmem:[%s2835_s2] ss:$0 sm:$0xff]  ;;  %v2118_v37 = vld [vmem:[%s2838_s5 + $0x18] sm:$0xff]   ;;  %v2122_v8 = vld [vmem:[%s2846_s13 + $0x8] sm:$0xff]  }
  0x51   :  { %1974 = vmatpush3.bf16.msra.mxu1 %v2108_v1  ;;  %1993 = vmatprep.subr.bf16.mxu0 %v2257_v44  ;;  %v2119_v38 = vld [vmem:[%s2840_s7] sm:$0x3f]   ;;  %v2154_v50 = vld [vmem:[%s2848_s15 + $0xec] ss:$28 sps:$4 sm:$0xff]  }
  0x52   :  { %1975 = vmatprep.subr.bf16.mxu1 %v2257_v44  ;;  %v855_v39 = vsel %vm853_vm2, %v2119_v38, 0  ;;  %v1771_v40 = vld [vmem:[%s2837_s4] ss:$0 sm:$0xff]  ;;  %v2152_v51 = vld [vmem:[%s2848_s15 + $0xe8] ss:$28 sps:$4 sm:$0xff]  }
  0x53   :  { %v1780_v49 = vld [vmem:[%s2839_s6] ss:$0 sm:$0xff] }
  0x54   :  { %1994 = vmatpush3.bf16.msra.mxu0 %v2116_v9  ;;  %v897_v55 = vld [vmem:[%s2842_s9] sm:$0x3] }
  0x55   :  { %1976 = vmatpush3.bf16.msra.mxu1 %v2109_v2  ;;  %1995 = vmatprep.subr.bf16.mxu0 %v2257_v44  ;;  %v915_v60 = vand.u32 %v913_v56, %v897_v55  ;;  %v1786_v62 = vld [vmem:[%s2841_s8] ss:$0 sm:$0xff]  ;;  %v2164_v55 = vld [vmem:[%s2848_s15 + $0x158] ss:$28 sps:$4 sm:$0xff]   ;;  %v2169_v56 = vld [vmem:[%s2848_s15 + $0x18c] ss:$28 sps:$4 sm:$0xff]  }
  0x56   :  { %1977 = vmatprep.subr.bf16.mxu1 %v2257_v44  ;;  %v2120_v63 = vld [vmem:[%s2844_s11] sm:$0x3f]  }
  0x57   :  { %v1789_v9 = vld [vmem:[%s2843_s10] ss:$0 sm:$0xff] }
  0x58   :  { %1996 = vmatpush3.bf16.msra.mxu0 %v2117_v36 }
  0x59   :  { %1978 = vmatpush3.bf16.msra.mxu1 %v2110_v3  ;;  %1997 = vmatprep.subr.bf16.mxu0 %v2257_v44 }
  0x5a   :  { %1979 = vmatprep.subr.bf16.mxu1 %v2257_v44 }
  0x5c   :  { %1998 = vmatpush3.bf16.msra.mxu0 %v2118_v37 }
  0x5d   :  { %1980 = vmatpush3.bf16.msra.mxu1 %v2111_v4  ;;  %2021 = vmatprep.subr.bf16.mxu0 %v2257_v44 }
  0x5e   :  { %1981 = vmatprep.subr.bf16.mxu1 %v2257_v44 }
  0x61   :  { %1982 = vmatpush3.bf16.msra.mxu1 %v2112_v5 }
  0x62   :  { %1983 = vmatprep.subr.bf16.mxu1 %v2257_v44 }
  0x65   :  { %1984 = vmatpush3.bf16.msra.mxu1 %v2113_v6  ;;  %v977_v6 = vsel %vm853_vm2, %v2120_v63, 0 }
  0x66   :  { %1985 = vmatprep.subr.bf16.mxu1 %v2257_v44 }
  0x69   :  { %1986 = vmatpush3.bf16.msra.mxu1 %v2114_v7  ;;  %v2121_v7 = vld [vmem:[%s2846_s13] sm:$0xff]  }
  0x6a   :  { %2003 = vmatprep.subr.bf16.mxu1 %v2257_v44 }
  0xfd   :  { %v1879_v10 = vpop.f32.mrb[0].mxu0 }
  0xfe   :  { %v1880_v12 = vpop.f32.mrb[1].mxu0 }
  0xff   :  { %v1881_v13 = vadd.f32 %v1880_v12, %v1879_v10  ;;  %v1882_v14 = vpop.f32.mrb[2].mxu0  ;;  %v1901_v15 = vpop.f32.mrb[0].mxu1 }
 0x100   :  { %v1883_v16 = vpop.f32.mrb[3].mxu0  ;;  %v1902_v18 = vpop.f32.mrb[1].mxu1 }
 0x101   :  { %v510_v17 = vadd.f32 %v1881_v13, %v1720_v11  ;;  %v1903_v19 = vadd.f32 %v1902_v18, %v1901_v15  ;;  %v1904_v20 = vpop.f32.mrb[2].mxu1  ;;  %v2124_v18 = vld [vmem:[%s2846_s13 + $0x18] sm:$0xff]  }
 0x102   :  { %v1905_v21 = vpop.f32.mrb[3].mxu1  ;;  %v2127_v20 = vld [vmem:[%s2848_s15 + $0x4] ss:$28 sps:$4 sm:$0xff]  }
 0x103   :  { %v550_v22 = vadd.f32 %v1903_v19, %v510_v17  ;;  %v2123_v17 = vld [vmem:[%s2846_s13 + $0x10] sm:$0xff]   ;;  %v2125_v19 = vld [vmem:[%s2848_s15] ss:$28 sps:$4 sm:$0xff]   ;;  %v2130_v21 = vld [vmem:[%s2848_s15 + $0xc] ss:$28 sps:$4 sm:$0xff]  }
 0x107   :  { %v629_v23 = vpop.f32.mrb[4].mxu1 }
 0x108   :  { %v1969_v24 = vpop.f32.mrb[5].mxu1 }
 0x109   :  { %v632_v25 = vpop.f32.mrb[6].mxu1  ;;  %v2139_v24 = vld [vmem:[%s2848_s15 + $0x74] ss:$28 sps:$4 sm:$0xff]  }
 0x10a   :  { %v1970_v26 = vpop.f32.mrb[7].mxu1  ;;  %v2137_v25 = vld [vmem:[%s2848_s15 + $0x70] ss:$28 sps:$4 sm:$0xff]  }
 0x10b   :  { %v2145_v26 = vld [vmem:[%s2848_s15 + $0xac] ss:$28 sps:$4 sm:$0xff]  }
 0x11d   :  { %v1923_v27 = vpop.f32.mrb[4].mxu0 }
 0x11e   :  { %v1924_v28 = vpop.f32.mrb[5].mxu0 }
 0x11f   :  { %v1925_v29 = vadd.f32 %v1924_v28, %v1923_v27  ;;  %v1926_v30 = vpop.f32.mrb[6].mxu0  ;;  %v2143_v27 = vld [vmem:[%s2848_s15 + $0xa8] ss:$28 sps:$4 sm:$0xff]  }
 0x120   :  { %v1927_v31 = vpop.f32.mrb[7].mxu0  ;;  %v2151_v28 = vld [vmem:[%s2848_s15 + $0xe4] ss:$28 sps:$4 sm:$0xff]   ;;  %v2157_v30 = vld [vmem:[%s2848_s15 + $0x11c] ss:$28 sps:$4 sm:$0xff]  }
 0x121   :  { %v590_v32 = vadd.f32 %v1925_v29, %v550_v22  ;;  %v2133_v22 = vld [vmem:[%s2848_s15 + $0x3c] ss:$28 sps:$4 sm:$0xff]  }
 0x122   :  { %v2149_v29 = vld [vmem:[%s2848_s15 + $0xe0] ss:$28 sps:$4 sm:$0xff]   ;;  %v2155_v31 = vld [vmem:[%s2848_s15 + $0x118] ss:$28 sps:$4 sm:$0xff]  }
 0x123   :  { %v630_v33 = vadd.f32 %v629_v23, %v590_v32  ;;  %v2131_v23 = vld [vmem:[%s2848_s15 + $0x38] ss:$28 sps:$4 sm:$0xff]  }
 0x124   :  { %v2163_v32 = vld [vmem:[%s2848_s15 + $0x154] ss:$28 sps:$4 sm:$0xff]  }
 0x125   :  { %v635_v34 = vmax.f32 %v630_v33, 0.0  ;;  %v2161_v33 = vld [vmem:[%s2848_s15 + $0x150] ss:$28 sps:$4 sm:$0xff]  }
 0x127   :  { %v653_v35 = vpack.c.bf16 %v635_v34, %v635_v34  ;;  %v1791_v34 = vld [vmem:[%s2845_s12] ss:$0 sm:$0xff] }
 0x129   :  { %1988 = vmatmul.mubr.bf16.vlgmr.msra.gmra.mrb[8].mxu1 %v653_v35 }
 0x12a   :  { %2005 = vmatprep.mubr.msk.bf16.mxu1 %vm2258_vm0, %v2257_v44  ;;  %2004 = vmatpush3.bf16.msra.mxu1 %v855_v39 }
 0x12b   :  { %2009 = vmatprep.subr.bf16.mxu1 %v2257_v44 }
 0x1fc   :  { %v742_v41 = vpop.f32.mrb[8].mxu1 }
 0x1fd   :  { %v743_v42 = vadd.f32 %v1771_v40, %v742_v41  ;;  %v1989_v43 = vpop.f32.mrb[9].mxu1  ;;  %v2128_v41 = vld [vmem:[%s2848_s15 + $0x8] ss:$28 sps:$4 sm:$0xff]  }
 0x1fe   :  { %v745_v45 = vpop.f32.mrb[10].mxu1  ;;  %v2136_v43 = vld [vmem:[%s2848_s15 + $0x44] ss:$28 sps:$4 sm:$0xff]  }
 0x1ff   :  { %v748_v46 = vmax.f32 %v743_v42, 0.0  ;;  %v1990_v47 = vpop.f32.mrb[11].mxu1  ;;  %v2134_v45 = vld [vmem:[%s2848_s15 + $0x40] ss:$28 sps:$4 sm:$0xff]  }
 0x200   :  { %v2140_v47 = vld [vmem:[%s2848_s15 + $0x78] ss:$28 sps:$4 sm:$0xff]  }
 0x201   :  { %v758_v48 = vpack.c.bf16 %v748_v46, %v748_v46  ;;  %v2142_v46 = vld [vmem:[%s2848_s15 + $0x7c] ss:$28 sps:$4 sm:$0xff]  }
 0x203   :  { %2000 = vmatmul.mubr.msk.bf16.vlgmr.msra.gmra.mrb[8].mxu0 %vm789_vm3, %v758_v48  ;;  %v2148_v48 = vld [vmem:[%s2848_s15 + $0xb4] ss:$28 sps:$4 sm:$0xff]  }
 0x204   :  { %2029 = vmatprep.mubr.msk.bf16.mxu0 %vm2258_vm0, %v2257_v44  ;;  %2022 = vmatpush3.bf16.msra.mxu0 %v2121_v7 }
 0x205   :  { %2023 = vmatprep.subr.bf16.mxu0 %v2257_v44 }
 0x208   :  { %2024 = vmatpush3.bf16.msra.mxu0 %v2122_v8  ;;  %v2179_v8 = vld [vmem:[%s2848_s15 + $0x4c] ss:$28 sps:$4 sm:$0xff]  }
 0x209   :  { %2025 = vmatprep.subr.bf16.mxu0 %v2257_v44 }
 0x20c   :  { %2026 = vmatpush3.bf16.msra.mxu0 %v2123_v17  ;;  %v2191_v17 = vld [vmem:[%s2848_s15 + $0xf4] ss:$28 sps:$4 sm:$0xff]  }
 0x20d   :  { %2027 = vmatprep.subr.bf16.mxu0 %v2257_v44 }
 0x210   :  { %2028 = vmatpush3.bf16.msra.mxu0 %v2124_v18  ;;  %v2189_v18 = vld [vmem:[%s2848_s15 + $0xf0] ss:$28 sps:$4 sm:$0xff]  }
 0x211   :  { %1535 = vmatprep.subr.bf16.mxu0 %v2130_v21  ;;  %v2193_v21 = vld [vmem:[%s2848_s15 + $0x128] ss:$28 sps:$4 sm:$0xff]  }
 0x2d6   :  { %v827_v52 = vpop.f32.mrb[8].mxu0 }
 0x2d7   :  { %v828_v53 = vadd.f32 %v1780_v49, %v827_v52  ;;  %v2001_v54 = vpop.f32.mrb[9].mxu0  ;;  %v2146_v49 = vld [vmem:[%s2848_s15 + $0xb0] ss:$28 sps:$4 sm:$0xff]   ;;  %v2160_v52 = vld [vmem:[%s2848_s15 + $0x124] ss:$28 sps:$4 sm:$0xff]  }
 0x2d8   :  { %v830_v57 = vpop.f32.mrb[10].mxu0  ;;  %v2166_v54 = vld [vmem:[%s2848_s15 + $0x15c] ss:$28 sps:$4 sm:$0xff]  }
 0x2d9   :  { %v833_v58 = vmax.f32 %v828_v53, 0.0  ;;  %v2002_v59 = vpop.f32.mrb[11].mxu0  ;;  %v2158_v53 = vld [vmem:[%s2848_s15 + $0x120] ss:$28 sps:$4 sm:$0xff]   ;;  %v2172_v57 = vld [vmem:[%s2848_s15 + $0x194] ss:$28 sps:$4 sm:$0xff]  }
 0x2da   :  { %v2170_v59 = vld [vmem:[%s2848_s15 + $0x190] ss:$28 sps:$4 sm:$0xff]  }
 0x2db   :  { %v837_v61 = vpack.c.bf16 %v833_v58, %v833_v58  ;;  %v2167_v58 = vld [vmem:[%s2848_s15 + $0x188] ss:$28 sps:$4 sm:$0xff]  }
 0x2dd   :  { %2006 = vmatmul.mubr.msk.bf16.vlgmr.msra.gmra.mrb[12].mxu1 %vm849_vm6, %v837_v61  ;;  %v2260_v61 = vmov 0  }
 0x2de   :  { %2010 = vmatpush3.bf16.msra.mxu1 %v915_v60  ;;  %2011 = vmatprep.mubr.msk.bf16.mxu1 %vm2258_vm0, %v2257_v44  ;;  %v2175_v60 = vld [vmem:[%s2848_s15 + $0x14] ss:$28 sps:$4 sm:$0xff]  }
 0x2df   :  { %2015 = vmatprep.subr.bf16.mxu1 %v2257_v44 }
 0x3b0   :  { %v891_v0 = vpop.f32.mrb[12].mxu1 }
 0x3b1   :  { %v892_v1 = vadd.f32 %v1786_v62, %v891_v0  ;;  %v2007_v2 = vpop.f32.mrb[13].mxu1  ;;  %v1794_v62 = vld [vmem:[%s2847_s14] ss:$0 sm:$0xff] }
 0x3b2   :  { %v894_v3 = vpop.f32.mrb[14].mxu1 }
 0x3b3   :  { %v899_v4 = vpack.c.bf16 %v892_v1, %v892_v1  ;;  %v2008_v5 = vpop.f32.mrb[15].mxu1 }
 0x3b4   :  { %v2173_v5 = vld [vmem:[%s2848_s15 + $0x10] ss:$28 sps:$4 sm:$0xff]  }
 0x3b5   :  { %2012 = vmatmul.mubr.msk.bf16.vlgmr.msra.gmra.mrb[16].mxu1 %vm906_vm7, %v899_v4 }
 0x3b6   :  { %2016 = vmatpush3.bf16.msra.mxu1 %v977_v6  ;;  %2017 = vmatprep.mubr.msk.bf16.mxu1 %vm2258_vm0, %v2257_v44  ;;  %v2176_v6 = vld [vmem:[%s2848_s15 + $0x18] ss:$28 sps:$4 sm:$0xff]  }
 0x3b7   :  { %1494 = vmatprep.subr.bf16.mxu1 %v2127_v20  ;;  %v2195_v20 = vld [vmem:[%s2848_s15 + $0x12c] ss:$28 sps:$4 sm:$0xff]  }
 0x488   :  { %v951_v10 = vpop.f32.mrb[16].mxu1 }
 0x489   :  { %v952_v11 = vadd.f32 %v1789_v9, %v951_v10  ;;  %v2013_v12 = vpop.f32.mrb[17].mxu1  ;;  %v2177_v9 = vld [vmem:[%s2848_s15 + $0x48] ss:$28 sps:$4 sm:$0xff]   ;;  %v2180_v10 = vld [vmem:[%s2848_s15 + $0x50] ss:$28 sps:$4 sm:$0xff]  }
 0x48a   :  { %v954_v13 = vpop.f32.mrb[18].mxu1  ;;  %v2181_v12 = vld [vmem:[%s2848_s15 + $0x80] ss:$28 sps:$4 sm:$0xff]  }
 0x48b   :  { %v957_v14 = vmax.f32 %v952_v11, 0.0  ;;  %v2014_v15 = vpop.f32.mrb[19].mxu1  ;;  %v2183_v11 = vld [vmem:[%s2848_s15 + $0x84] ss:$28 sps:$4 sm:$0xff]  }
 0x48c   :  { %v2184_v13 = vld [vmem:[%s2848_s15 + $0x88] ss:$28 sps:$4 sm:$0xff]   ;;  %v2185_v15 = vld [vmem:[%s2848_s15 + $0xb8] ss:$28 sps:$4 sm:$0xff]  }
 0x48d   :  { %v961_v16 = vpack.c.bf16 %v957_v14, %v957_v14  ;;  %v2187_v14 = vld [vmem:[%s2848_s15 + $0xbc] ss:$28 sps:$4 sm:$0xff]  }
 0x48f   :  { %2018 = vmatmul.mubr.msk.bf16.vlgmr.msra.gmra.mrb[20].mxu1 %vm849_vm6, %v961_v16  ;;  %v2188_v16 = vld [vmem:[%s2848_s15 + $0xc0] ss:$28 sps:$4 sm:$0xff]  }
 0x490   :  { %1495 = vmatpush1.bf16.msra.mxu1 %v2125_v19  ;;  %1526 = vmatprep.mubr.bf16.mxu1 %v2260_v61  ;;  %v2192_v19 = vld [vmem:[%s2848_s15 + $0xf8] ss:$28 sps:$4 sm:$0xff]  }
 0x491   :  { %1496 = vmatprep.subr.bf16.mxu1 %v2133_v22  ;;  %v2196_v22 = vld [vmem:[%s2848_s15 + $0x130] ss:$28 sps:$4 sm:$0xff]  }
 0x494   :  { %1497 = vmatpush1.bf16.msra.mxu1 %v2131_v23  ;;  %v2199_v23 = vld [vmem:[%s2848_s15 + $0x164] ss:$28 sps:$4 sm:$0xff]  }
 0x495   :  { %1498 = vmatprep.subr.bf16.mxu1 %v2139_v24  ;;  %v2197_v24 = vld [vmem:[%s2848_s15 + $0x160] ss:$28 sps:$4 sm:$0xff]  }
 0x498   :  { %1499 = vmatpush1.bf16.msra.mxu1 %v2137_v25  ;;  %v2200_v25 = vld [vmem:[%s2848_s15 + $0x168] ss:$28 sps:$4 sm:$0xff]  }
 0x499   :  { %1500 = vmatprep.subr.bf16.mxu1 %v2145_v26  ;;  %v2203_v26 = vld [vmem:[%s2848_s15 + $0x19c] ss:$28 sps:$4 sm:$0xff]  }
 0x49c   :  { %1501 = vmatpush1.bf16.msra.mxu1 %v2143_v27  ;;  %v2201_v27 = vld [vmem:[%s2848_s15 + $0x198] ss:$28 sps:$4 sm:$0xff]  }
 0x49d   :  { %1502 = vmatprep.subr.bf16.mxu1 %v2151_v28  ;;  %v2204_v28 = vld [vmem:[%s2848_s15 + $0x1a0] ss:$28 sps:$4 sm:$0xff]   ;;  %s2261_s15 = smov [#allocation2]  }
 0x4a0   :  { %1503 = vmatpush1.bf16.msra.mxu1 %v2149_v29  ;;  %v1171_v29 = vlaneseq }
 0x4a1   :  { %1504 = vmatprep.subr.bf16.mxu1 %v2157_v30 }
 0x4a2   :  { %v1172_v30 = vshrl.u32 %v1171_v29, 7 }
 0x4a4   :  { %1505 = vmatpush1.bf16.msra.mxu1 %v2155_v31  ;;  %v1173_v31 = vsub.s32 0, %v1172_v30 }
 0x4a5   :  { %1506 = vmatprep.subr.bf16.mxu1 %v2163_v32  ;;  %v1181_v32 = vsub.s32 2, %v1172_v30 }
 0x4a8   :  { %1507 = vmatpush1.bf16.msra.mxu1 %v2161_v33  ;;  %v1168_v33 = vld [vmem:[%s2849_s16] sm:$0x7f]  ;;  %s1712_s16 = sshll.u32 %s2261_s15, 4  ;;  %s1713_s16 = int_to_ptr.vmem [resolvable:$true] %s1712_s16 }
 0x4a9   :  { %1508 = vmatprep.subr.bf16.mxu1 %v2169_v56  ;;  %s2233_s7 = scalar_lea.vmem %s1713_s16, 896  ;;  %p2238_p1 = scmp.lt.s32.totalorder %s1713_s16, %s1713_s16 }
 0x4aa   :  { %p2234_p0 = scmp.ne.s32.totalorder %s1713_s16, %s2233_s7  ;;  %p2239_p2 = scmp.lt.s32.totalorder %s2233_s7, %s2233_s7 }
 0x4ac   :  { %1509 = vmatpush1.bf16.msra.mxu1 %v2167_v58  ;;  %p2240_p3 = por %p2239_p2, %p2238_p1 }
 0x4ad   :  { %1576 = vmatprep.subr.bf16.mxu1 %v2175_v60 }
 0x4ae   :  { %p2241_p4 = pnand %p2240_p3, %p2234_p0 }
 0x562   :  { %v1013_v35 = vpop.f32.mrb[20].mxu1 }
 0x563   :  { %v1014_v36 = vadd.f32 %v1791_v34, %v1013_v35  ;;  %v2019_v37 = vpop.f32.mrb[21].mxu1  ;;  %v1177_v34 = vsub.s32 1, %v1172_v30  ;;  %v1185_v35 = vsub.s32 3, %v1172_v30 }
 0x564   :  { %v1016_v38 = vpop.f32.mrb[22].mxu1  ;;  %v1182_v37 = vrot.slane %v1168_v33, %v1181_v32 }
 0x565   :  { %v1019_v39 = vmax.f32 %v1014_v36, 0.0  ;;  %v2020_v40 = vpop.f32.mrb[23].mxu1  ;;  %v1174_v36 = vrot.slane %v1168_v33, %v1173_v31  ;;  %v1178_v38 = vrot.slane %v1168_v33, %v1177_v34 }
 0x567   :  { %v1029_v42 = vpack.c.bf16 %v1019_v39, %v1019_v39  ;;  %v1186_v39 = vrot.slane %v1168_v33, %v1185_v35 }
 0x569   :  { %2030 = vmatmul.mubr.msk.bf16.vlgmr.msra.gmra.mrb[12].mxu0 %vm789_vm3, %v1029_v42 }
 0x56a   :  { %1536 = vmatpush1.bf16.msra.mxu0 %v2128_v41  ;;  %1567 = vmatprep.mubr.bf16.mxu0 %v2260_v61 }
 0x56b   :  { %1537 = vmatprep.subr.bf16.mxu0 %v2136_v43 }
 0x56e   :  { %1538 = vmatpush1.bf16.msra.mxu0 %v2134_v45 }
 0x56f   :  { %1539 = vmatprep.subr.bf16.mxu0 %v2142_v46 }
 0x572   :  { %1540 = vmatpush1.bf16.msra.mxu0 %v2140_v47 }
 0x573   :  { %1541 = vmatprep.subr.bf16.mxu0 %v2148_v48 }
 0x576   :  { %1542 = vmatpush1.bf16.msra.mxu0 %v2146_v49 }
 0x577   :  { %1543 = vmatprep.subr.bf16.mxu0 %v2154_v50 }
 0x57a   :  { %1544 = vmatpush1.bf16.msra.mxu0 %v2152_v51 }
 0x57b   :  { %1545 = vmatprep.subr.bf16.mxu0 %v2160_v52 }
 0x57e   :  { %1546 = vmatpush1.bf16.msra.mxu0 %v2158_v53 }
 0x57f   :  { %1547 = vmatprep.subr.bf16.mxu0 %v2166_v54 }
 0x582   :  { %1548 = vmatpush1.bf16.msra.mxu0 %v2164_v55 }
 0x583   :  { %1549 = vmatprep.subr.bf16.mxu0 %v2172_v57 }
 0x586   :  { %1550 = vmatpush1.bf16.msra.mxu0 %v2170_v59 }
 0x587   :  { %2033 = vmatprep.subr.bf16.mxu0 %v2257_v44 }
 0x63c   :  { %v1097_v63 = vpop.f32.mrb[12].mxu0 }
 0x63d   :  { %v1098_v0 = vadd.f32 %v1794_v62, %v1097_v63  ;;  %v2031_v1 = vpop.f32.mrb[13].mxu0 }
 0x63e   :  { %v1100_v2 = vpop.f32.mrb[14].mxu0  ;;  %v1197_v1 = vsub.s32 6, %v1172_v30 }
 0x63f   :  { %v1103_v3 = vmax.f32 %v1098_v0, 0.0  ;;  %v2032_v4 = vpop.f32.mrb[15].mxu0  ;;  %v1189_v0 = vsub.s32 4, %v1172_v30  ;;  %v1193_v2 = vsub.s32 5, %v1172_v30 }
 0x641   :  { %v1169_v7 = vpack.c.bf16 %v1103_v3, %v1103_v3 }
 0x643   :  { %1527 = vmatmul.mubr.bf16.vlgmr.msra.gmra.mrb[24].mxu1 %v1169_v7  ;;  %1568 = vmatmul.mubr.bf16.vlgmr.msra.gmra.mrb[16].mxu0 %v1169_v7 }
 0x644   :  { %1577 = vmatpush1.bf16.msra.mxu1 %v2173_v5  ;;  %2034 = vmatpush3.bf16.msra.mxu0 %v2176_v6  ;;  %v1190_v5 = vrot.slane %v1168_v33, %v1189_v0  ;;  %v1198_v6 = vrot.slane %v1168_v33, %v1197_v1 }
 0x645   :  { %1578 = vmatprep.subr.bf16.mxu1 %v2179_v8  ;;  %2035 = vmatprep.subr.bf16.mxu0 %v2257_v44  ;;  %v1194_v8 = vrot.slane %v1168_v33, %v1193_v2 }
 0x646   :  { %1608 = vmatprep.mubr.bf16.mxu1 %v2260_v61  ;;  %2049 = vmatprep.mubr.msk.bf16.mxu0 %vm2258_vm0, %v2257_v44 }
 0x648   :  { %1579 = vmatpush1.bf16.msra.mxu1 %v2177_v9  ;;  %2036 = vmatpush3.bf16.msra.mxu0 %v2180_v10 }
 0x649   :  { %1580 = vmatprep.subr.bf16.mxu1 %v2183_v11  ;;  %2037 = vmatprep.subr.bf16.mxu0 %v2257_v44 }
 0x64c   :  { %1581 = vmatpush1.bf16.msra.mxu1 %v2181_v12  ;;  %2038 = vmatpush3.bf16.msra.mxu0 %v2184_v13 }
 0x64d   :  { %1582 = vmatprep.subr.bf16.mxu1 %v2187_v14  ;;  %2039 = vmatprep.subr.bf16.mxu0 %v2257_v44 }
 0x650   :  { %1583 = vmatpush1.bf16.msra.mxu1 %v2185_v15  ;;  %2040 = vmatpush3.bf16.msra.mxu0 %v2188_v16 }
 0x651   :  { %1584 = vmatprep.subr.bf16.mxu1 %v2191_v17  ;;  %2041 = vmatprep.subr.bf16.mxu0 %v2257_v44 }
 0x654   :  { %1585 = vmatpush1.bf16.msra.mxu1 %v2189_v18  ;;  %2042 = vmatpush3.bf16.msra.mxu0 %v2192_v19 }
 0x655   :  { %1586 = vmatprep.subr.bf16.mxu1 %v2195_v20  ;;  %2043 = vmatprep.subr.bf16.mxu0 %v2257_v44 }
 0x658   :  { %1587 = vmatpush1.bf16.msra.mxu1 %v2193_v21  ;;  %2044 = vmatpush3.bf16.msra.mxu0 %v2196_v22 }
 0x659   :  { %1588 = vmatprep.subr.bf16.mxu1 %v2199_v23  ;;  %2045 = vmatprep.subr.bf16.mxu0 %v2257_v44 }
 0x65c   :  { %1589 = vmatpush1.bf16.msra.mxu1 %v2197_v24  ;;  %2046 = vmatpush3.bf16.msra.mxu0 %v2200_v25 }
 0x65d   :  { %1590 = vmatprep.subr.bf16.mxu1 %v2203_v26  ;;  %2047 = vmatprep.subr.bf16.mxu0 %v2257_v44 }
 0x660   :  { %1591 = vmatpush1.bf16.msra.mxu1 %v2201_v27  ;;  %2048 = vmatpush3.bf16.msra.mxu0 %v2204_v28 }
 0x663   :  { %1609 = vmatmul.mubr.bf16.vlgmr.msra.gmra.mrb[28].mxu1 %v1169_v7  ;;  %2050 = vmatmul.mubr.bf16.vlgmr.msra.gmra.mrb[20].mxu0 %v1169_v7 }
 0x716   :  { %v1528_v40 = vpop.f32.mrb[24].mxu1  ;;  %v1569_v44 = vpop.f32.mrb[16].mxu0 }
 0x717   :  { %v1529_v41 = vadd.f32 %v1528_v40, %v1174_v36  ;;  %v1570_v42 = vadd.f32 %v1569_v44, %v1182_v37  ;;  %v1530_v43 = vpop.f32.mrb[25].mxu1  ;;  %v1571_v45 = vpop.f32.mrb[17].mxu0 }
 0x718   :  { %v1531_v46 = vadd.f32 %v1530_v43, %v1178_v38  ;;  %v1572_v47 = vadd.f32 %v1571_v45, %v1186_v39  ;;  %v1532_v48 = vpop.f32.mrb[26].mxu1  ;;  %v1573_v49 = vpop.f32.mrb[18].mxu0 }
 0x719   :  { %v1856_v50 = vmul.f32 -1.442695, %v1529_v41  ;;  %v1858_v51 = vmul.f32 -1.442695, %v1570_v42  ;;  %v1533_v52 = vpop.f32.mrb[27].mxu1  ;;  %v1574_v53 = vpop.f32.mrb[19].mxu0 }
 0x71a   :  { %v1857_v54 = vmul.f32 -1.442695, %v1531_v46  ;;  %v1859_v55 = vmul.f32 -1.442695, %v1572_v47 }
 0x71b   :  { %2205 = vpow2.f32 %v1856_v50 }
 0x71c   :  { %2207 = vpow2.f32 %v1858_v51 }
 0x71d   :  { %2209 = vpow2.f32 %v1857_v54 }
 0x71e   :  { %2211 = vpow2.f32 %v1859_v55 }
 0x725   :  { %v2206_v56 = vpop.eup %2205 }
 0x726   :  { %v2208_v57 = vpop.eup %2207  ;;  %v1678_v58 = vadd.f32 1.0, %v2206_v56 }
 0x727   :  { %v2210_v59 = vpop.eup %2209  ;;  %v1680_v60 = vadd.f32 1.0, %v2208_v57 }
 0x728   :  { %v2212_v61 = vpop.eup %2211  ;;  %2213 = vrcp.f32 %v1678_v58  ;;  %v1679_v62 = vadd.f32 1.0, %v2210_v59 }
 0x729   :  { %2215 = vrcp.f32 %v1680_v60  ;;  %v1681_v63 = vadd.f32 1.0, %v2212_v61 }
 0x72a   :  { %2217 = vrcp.f32 %v1679_v62 }
 0x72b   :  { %2219 = vrcp.f32 %v1681_v63 }
 0x732   :  { %v2214_v3 = vpop.eup %2213 }
 0x733   :  { %v2216_v4 = vpop.eup %2215  ;;  %1699 = vst [vmem:[#allocation2] sm:$0xff] %v2214_v3 }
 0x734   :  { %v2218_v7 = vpop.eup %2217  ;;  %1701 = vst [vmem:[#allocation2 + $0x10] sm:$0xff] %v2216_v4 }
 0x735   :  { %v2220_v9 = vpop.eup %2219  ;;  %1700 = vst [vmem:[#allocation2 + $0x8] sm:$0xff] %v2218_v7 }
 0x736   :  { %1702 = vst [vmem:[#allocation2 + $0x18] sm:$0xff] %v2220_v9  ;;  %v1610_v10 = vpop.f32.mrb[28].mxu1  ;;  %v1651_v11 = vpop.f32.mrb[20].mxu0 }
 0x737   :  { %v1611_v12 = vadd.f32 %v1610_v10, %v1190_v5  ;;  %v1652_v13 = vadd.f32 %v1651_v11, %v1198_v6  ;;  %v1612_v14 = vpop.f32.mrb[29].mxu1  ;;  %v2051_v15 = vpop.f32.mrb[21].mxu0 }
 0x738   :  { %v1613_v16 = vadd.f32 %v1612_v14, %v1194_v8  ;;  %v1614_v17 = vpop.f32.mrb[30].mxu1  ;;  %v1654_v18 = vpop.f32.mrb[22].mxu0 }
 0x739   :  { %v1860_v19 = vmul.f32 -1.442695, %v1611_v12  ;;  %v1862_v20 = vmul.f32 -1.442695, %v1652_v13  ;;  %v1615_v21 = vpop.f32.mrb[31].mxu1  ;;  %v2052_v22 = vpop.f32.mrb[23].mxu0 }
 0x73a   :  { %v1861_v23 = vmul.f32 -1.442695, %v1613_v16 }
 0x73b   :  { %2221 = vpow2.f32 %v1860_v19 }
 0x73c   :  { %2223 = vpow2.f32 %v1862_v20 }
 0x73d   :  { %2225 = vpow2.f32 %v1861_v23 }
 0x745   :  { %v2222_v24 = vpop.eup %2221 }
 0x746   :  { %v2224_v25 = vpop.eup %2223  ;;  %v1682_v26 = vadd.f32 1.0, %v2222_v24 }
 0x747   :  { %v2226_v27 = vpop.eup %2225  ;;  %v1684_v28 = vadd.f32 1.0, %v2224_v25 }
 0x748   :  { %2227 = vrcp.f32 %v1682_v26  ;;  %v1683_v29 = vadd.f32 1.0, %v2226_v27 }
 0x749   :  { %2229 = vrcp.f32 %v1684_v28 }
 0x74a   :  { %2231 = vrcp.f32 %v1683_v29 }
 0x752   :  { %v2228_v30 = vpop.eup %2227 }
 0x753   :  { %v2230_v31 = vpop.eup %2229  ;;  %1703 = vst [vmem:[#allocation2 + $0x20] sm:$0xff] %v2228_v30 }
 0x754   :  { %v2232_v32 = vpop.eup %2231  ;;  %1705 = vst.msk [vmem:[#allocation2 + $0x30] sm:$0xff] %vm471_vm1, %v2230_v31 }
 0x755   :  { %1704 = vst [vmem:[#allocation2 + $0x28] sm:$0xff] %v2232_v32 }
 0x756   :  { %2244 = shalt.err (!%p2241_p4)
}
 0x757   :  { %s2245_s27 = scalar_lea.hbm %s2850_s17, 896 }
 0x758   :  { %p2246_p5 = scmp.ne.s32.totalorder %s2850_s17, %s2245_s27  ;;  %p2249_p6 = scmp.lt.u32.totalorder %s2245_s27, %s2850_s17 }
 0x75a   :  { %p2251_p7 = pnand %p2249_p6, %p2246_p5 }
 0x75c   :  { %2254 = shalt.err (!%p2251_p7)
}
 0x75d   :  { %1715 = dma.vmem_to_hbm [thread:$0]  %s1713_s16, 896, %s2850_s17, [#allocation3]  }
 0x75e   :  { %2255 = dma.done.wait [#allocation3], 896  }
 0x75f   :  { %2256 = vsyncadd [#allocation3], 4294966400 }
 0x760   :  { %1719 = vsyncpa [#allocation3], 1 }

</bundles_post_ra>
